<compile_context>
chip_gen: v7x
topology: tpu7x:2x2x1
jax: 0.10.0
libtpu: 0.0.40
codegen_flags: <defaults>
</compile_context>

<pallas_src>
import jax
import jax.numpy as jnp
from jax.experimental import pallas as pl
from jax.experimental.pallas import tpu as pltpu


def _round_up(v, m):
    return ((v + m - 1) // m) * m


def hidden_layer_kernel(x_ref, w_ref, b_ref, o_ref, acc_ref):
    """Grid = (batch tiles i, hidden tiles j, reduction tiles k); k is last/"arbitrary".

    x_ref:   (tile_b, tile_k)   activation tile
    w_ref:   (tile_k, tile_n)   pre-transposed weight tile (no in-kernel transpose)
    b_ref:   (1, tile_n)        bias tile (f32)
    o_ref:   (tile_b, tile_n)   output tile
    acc_ref: (tile_b, tile_n)   f32 VMEM accumulator, persists across k steps
    """
    k = pl.program_id(2)

    @pl.when(k == 0)
    def _init():
        acc_ref[...] = jnp.zeros_like(acc_ref)

    acc_ref[...] += jnp.dot(
        x_ref[...], w_ref[...], preferred_element_type=jnp.float32
    )

    # Epilogue only once per output tile, on the final reduction step.
    @pl.when(k == pl.num_programs(2) - 1)
    def _finalize():
        y = acc_ref[...] + b_ref[...]
        o_ref[...] = jnp.maximum(y, 0.0).astype(o_ref.dtype)


def hidden_layer(x, w, b, *, tile_b=None, tile_n=None, tile_k=None):
    """y = relu(x @ w.T + b).  x: (..., D_in), w: (H, D_in) [nn.Linear], b: (H,)."""
    orig_shape = x.shape
    D_in = orig_shape[-1]
    x2 = x.reshape(-1, D_in)
    B = x2.shape[0]
    H = w.shape[0]
    out_dtype = x.dtype

    # ---- One-time layout prep (amortized XLA ops, outside the kernel) ----------
    w_t = jnp.transpose(w)                      # (D_in, H): kernel does plain x @ W
    Hp = max(_round_up(H, 128), 128)            # lane-dense output (unmasked stores)
    if Hp != H:
        w_t = jnp.pad(w_t, ((0, 0), (0, Hp - H)))
        b = jnp.pad(b, (0, Hp - H))
    b2d = b.reshape(1, Hp).astype(jnp.float32)

    # ---- Tile selection ---------------------------------------------------------
    # Batch tiles so x/out DMAs pipeline against the MXU and both v7x TCs get work.
    if tile_b is None:
        tile_b = B if B <= 256 else 256
    # Hidden (N) tiles: 128/256-aligned -> VMEM use independent of H.
    if tile_n is None:
        tile_n = 256 if Hp % 256 == 0 else 128
        tile_n = min(tile_n, Hp)
    # K (reduction) tiles: aligned chunks when D_in is 128-aligned, else one full pass.
    if tile_k is None:
        if D_in % 512 == 0:
            tile_k = 512
        elif D_in % 256 == 0:
            tile_k = 256
        elif D_in % 128 == 0:
            tile_k = 128
        else:
            tile_k = D_in
    if Hp % tile_n != 0:
        raise ValueError("tile_n must divide the (padded) hidden dim")
    if D_in % tile_k != 0:
        raise ValueError("tile_k must divide input_dim (partial K tiles are unsafe)")

    grid = (pl.cdiv(B, tile_b), Hp // tile_n, D_in // tile_k)

    # Explicit VMEM budget: double-buffered x/W/bias/out + f32 accumulator, with
    # headroom, clamped so it is safe even on v7x's 64 MiB physical VMEM.
    vmem_bytes = 4 * (2 * tile_b * tile_k + 2 * tile_k * tile_n
                      + 2 * tile_n + 3 * tile_b * tile_n)
    vmem_limit = int(min(max(2 * vmem_bytes, 32 * 1024 * 1024), 48 * 1024 * 1024))

    out = pl.pallas_call(
        hidden_layer_kernel,
        out_shape=jax.ShapeDtypeStruct((B, Hp), out_dtype),
        grid_spec=pltpu.PrefetchScalarGridSpec(
            num_scalar_prefetch=0,
            grid=grid,
            in_specs=[
                pl.BlockSpec((tile_b, tile_k), lambda i, j, k: (i, k)),  # x
                pl.BlockSpec((tile_k, tile_n), lambda i, j, k: (k, j)),  # W^T (pre-transposed)
                pl.BlockSpec((1, tile_n), lambda i, j, k: (0, j)),       # bias
            ],
            out_specs=pl.BlockSpec((tile_b, tile_n), lambda i, j, k: (i, j)),
            scratch_shapes=[pltpu.VMEM((tile_b, tile_n), jnp.float32)],
        ),
        compiler_params=pltpu.CompilerParams(
            dimension_semantics=("parallel", "parallel", "arbitrary"),
            vmem_limit_bytes=vmem_limit,
        ),
    )(x2, w_t, b2d)

    if Hp != H:
        out = out[:, :H]
    return out.reshape(*orig_shape[:-1], H)


if __name__ == "__main__":
    key = jax.random.PRNGKey(0)

    # --- Small demo shapes implied by the module: x (batch, input_dim) ----------
    batch, input_dim, hidden_dim = 8, 32, 32
    kx, kw, kb = jax.random.split(key, 3)
    x = jax.random.normal(kx, (batch, input_dim), dtype=jnp.float32)
    bound = 1.0 / (input_dim ** 0.5)
    w = jax.random.uniform(kw, (hidden_dim, input_dim), dtype=jnp.float32,
                           minval=-bound, maxval=bound)
    b = jax.random.uniform(kb, (hidden_dim,), dtype=jnp.float32,
                           minval=-bound, maxval=bound)

    y = hidden_layer(x, w, b)
    jax.block_until_ready(y)
    y_ref = jnp.maximum(x @ w.T + b, 0.0)
    assert y.shape == (batch, hidden_dim)
    assert jnp.allclose(y, y_ref, atol=1e-5, rtol=1e-5), "mismatch vs reference (small)"

    # --- Second check exercising the tiled path: partial batch tile, N padding,
    #     multiple K steps with the f32 accumulator. ------------------------------
    B2, D2, H2 = 260, 384, 200   # grid_b=2 (partial), grid_k=3, H padded 200->256
    k2x, k2w, k2b = jax.random.split(jax.random.PRNGKey(1), 3)
    x2 = jax.random.normal(k2x, (B2, D2), dtype=jnp.float32)
    bound2 = 1.0 / (D2 ** 0.5)
    w2 = jax.random.uniform(k2w, (H2, D2), dtype=jnp.float32,
                            minval=-bound2, maxval=bound2)
    b2 = jax.random.uniform(k2b, (H2,), dtype=jnp.float32,
                            minval=-bound2, maxval=bound2)

    y2 = hidden_layer(x2, w2, b2)
    jax.block_until_ready(y2)
    y2_ref = jnp.maximum(x2 @ w2.T + b2, 0.0)
    assert y2.shape == (B2, H2)
    assert jnp.allclose(y2, y2_ref, atol=2e-3, rtol=2e-3), "mismatch vs reference (tiled)"

    print("KERNEL_OK")
</pallas_src>

<mosaic_0001>
module attributes {stable_mosaic.version = 11 : i64} {
  func.func @hidden_layer_kernel(%arg0: i32, %arg1: i32, %arg2: i32, %arg3: memref<8x32xf32, #tpu.memory_space<vmem>>, %arg4: memref<32x128xf32, #tpu.memory_space<vmem>>, %arg5: memref<1x128xf32, #tpu.memory_space<vmem>>, %arg6: memref<8x128xf32, #tpu.memory_space<vmem>>, %arg7: memref<8x128xf32, #tpu.memory_space<vmem>>) attributes {dimension_semantics = [#tpu.dimension_semantics<parallel>, #tpu.dimension_semantics<parallel>, #tpu.dimension_semantics<arbitrary>], iteration_bounds = array<i64: 1, 1, 1>, scalar_prefetch = 0 : i64, scratch_operands = 1 : i64, tpu.core_type = #tpu.core_type<tc>, window_params = [{transform_indices = @transform_0, window_bounds = array<i64: 8, 32>}, {transform_indices = @transform_1, window_bounds = array<i64: 32, 128>}, {transform_indices = @transform_2, window_bounds = array<i64: 1, 128>}, {transform_indices = @transform_3, window_bounds = array<i64: 8, 128>}]} {
    %c0_i32 = arith.constant 0 : i32
    %0 = arith.cmpi eq, %arg2, %c0_i32 : i32
    %1 = arith.extui %0 : i1 to i32
    %c0_i32_0 = arith.constant 0 : i32
    %2 = arith.cmpi ne, %1, %c0_i32_0 : i32
    scf.if %2 {
      %cst_10 = arith.constant 0.000000e+00 : f32
      %12 = vector.broadcast %cst_10 : f32 to vector<8x128xf32>
      %c0_11 = arith.constant 0 : index
      %c0_12 = arith.constant 0 : index
      %13 = vector.load %arg7[%c0_11, %c0_12] : memref<8x128xf32, #tpu.memory_space<vmem>>, vector<8x128xf32>
      tpu.vector_store %arg7[%c0_11, %c0_12], %12 {strides = array<i32>} : memref<8x128xf32, #tpu.memory_space<vmem>>, vector<8x128xf32>,
    } else {
    }
    %c0 = arith.constant 0 : index
    %c0_1 = arith.constant 0 : index
    %3 = vector.load %arg7[%c0, %c0_1] : memref<8x128xf32, #tpu.memory_space<vmem>>, vector<8x128xf32>
    %c0_2 = arith.constant 0 : index
    %c0_3 = arith.constant 0 : index
    %4 = vector.load %arg3[%c0_2, %c0_3] : memref<8x32xf32, #tpu.memory_space<vmem>>, vector<8x32xf32>
    %c0_4 = arith.constant 0 : index
    %c0_5 = arith.constant 0 : index
    %5 = vector.load %arg4[%c0_4, %c0_5] : memref<32x128xf32, #tpu.memory_space<vmem>>, vector<32x128xf32>
    %cst = arith.constant dense<0.000000e+00> : vector<8x128xf32>
    %6 = tpu.matmul %4, %5, %cst {dimension_numbers = #tpu.dot_dimension_numbers<[1], [0], [0], [1], [0, 0, 1, 1], [], []>} : vector<8x32xf32>, vector<32x128xf32>, vector<8x128xf32> -> vector<8x128xf32>
    %7 = arith.addf %3, %6 : vector<8x128xf32>
    %c0_6 = arith.constant 0 : index
    %c0_7 = arith.constant 0 : index
    %8 = vector.load %arg7[%c0_6, %c0_7] : memref<8x128xf32, #tpu.memory_space<vmem>>, vector<8x128xf32>
    tpu.vector_store %arg7[%c0_6, %c0_7], %7 {strides = array<i32>} : memref<8x128xf32, #tpu.memory_space<vmem>>, vector<8x128xf32>,
    %c0_i32_8 = arith.constant 0 : i32
    %9 = arith.cmpi eq, %arg2, %c0_i32_8 : i32
    %10 = arith.extui %9 : i1 to i32
    %c0_i32_9 = arith.constant 0 : i32
    %11 = arith.cmpi ne, %10, %c0_i32_9 : i32
    scf.if %11 {
      %c0_10 = arith.constant 0 : index
      %c0_11 = arith.constant 0 : index
      %12 = vector.load %arg7[%c0_10, %c0_11] : memref<8x128xf32, #tpu.memory_space<vmem>>, vector<8x128xf32>
      %c0_12 = arith.constant 0 : index
      %c0_13 = arith.constant 0 : index
      %13 = vector.load %arg5[%c0_12, %c0_13] : memref<1x128xf32, #tpu.memory_space<vmem>>, vector<1x128xf32>
      %14 = vector.broadcast %13 : vector<1x128xf32> to vector<8x128xf32>
      %15 = arith.addf %12, %14 : vector<8x128xf32>
      %cst_14 = arith.constant 0.000000e+00 : f32
      %16 = vector.broadcast %cst_14 : f32 to vector<8x128xf32>
      %17 = arith.maximumf %15, %16 : vector<8x128xf32>
      %c0_15 = arith.constant 0 : index
      %c0_16 = arith.constant 0 : index
      %18 = vector.load %arg6[%c0_15, %c0_16] : memref<8x128xf32, #tpu.memory_space<vmem>>, vector<8x128xf32>
      tpu.vector_store %arg6[%c0_15, %c0_16], %17 {strides = array<i32>} : memref<8x128xf32, #tpu.memory_space<vmem>>, vector<8x128xf32>,
    } else {
    }
    return
  }
  func.func @transform_0(%arg0: i32, %arg1: i32, %arg2: i32) -> (i32, i32) {
    %c0_i32 = arith.constant 0 : i32
    return %arg0, %arg2 : i32, i32
  }
  func.func @transform_1(%arg0: i32, %arg1: i32, %arg2: i32) -> (i32, i32) {
    %c0_i32 = arith.constant 0 : i32
    return %arg2, %arg1 : i32, i32
  }
  func.func @transform_2(%arg0: i32, %arg1: i32, %arg2: i32) -> (i32, i32) {
    %c0_i32 = arith.constant 0 : i32
    %c0_i32_0 = arith.constant 0 : i32
    return %c0_i32, %arg1 : i32, i32
  }
  func.func @transform_3(%arg0: i32, %arg1: i32, %arg2: i32) -> (i32, i32) {
    %c0_i32 = arith.constant 0 : i32
    return %arg0, %arg1 : i32, i32
  }
}

</mosaic_0001>

<bundles_post_ra>
// kernel: tpu_custom_call.1
= control target key start
LH: loop header
LB: loop body
LE: loop exit
PB: predicated region body
PF: predicated region fallthrough
CT: control target
= control target key end

     0   :  { %8 = vsyncpa [#allocation4], 0  ;;  %s336_s0 = inlined_call_operand.hbm [shape: f32[8,32], index: 0, kind: input, shape index: {}]   ;;  %s337_s1 = inlined_call_operand.hbm [shape: f32[32,128], index: 1, kind: input, shape index: {}]   ;;  %s338_s2 = inlined_call_operand.vmem [shape: f32[1,128], index: 2, kind: input, shape index: {}]   ;;  %s339_s3 = inlined_call_operand.hbm [shape: f32[8,128], index: 3, kind: output, shape index: {}]  }
   0x1   :  { %9 = vsyncpa [#allocation7], 0 }
   0x2   :  { %10 = vsyncpa [#allocation5], 0  ;;  %s262_s12 = smov [#allocation3]   ;;  %s263_s14 = smov [#allocation6]  }
   0x3   :  { %s17_s13 = sshll.u32 %s262_s12, 4  ;;  %s26_s15 = sshll.u32 %s263_s14, 4  ;;  %s18_s13 = int_to_ptr.vmem [resolvable:$true] %s17_s13  ;;  %s290_s15 = int_to_ptr.vmem [resolvable:$true] %s26_s15 }
   0x4   :  { %s190_s18 = scalar_lea.hbm %s336_s0, 128 }
   0x5   :  { %p191_p0 = scmp.ne.s32.totalorder %s336_s0, %s190_s18  ;;  %p194_p1 = scmp.lt.u32.totalorder %s190_s18, %s336_s0 }
   0x7   :  { %p196_p2 = pnand %p194_p1, %p191_p0 }
   0x9   :  { %199 = shalt.err (!%p196_p2)
}
   0xa   :  { %s200_s23 = scalar_lea.vmem %s18_s13, 128  ;;  %p205_p4 = scmp.lt.s32.totalorder %s18_s13, %s18_s13 }
   0xb   :  { %p201_p3 = scmp.ne.s32.totalorder %s18_s13, %s200_s23  ;;  %p206_p5 = scmp.lt.s32.totalorder %s200_s23, %s200_s23 }
   0xd   :  { %p207_p6 = por %p206_p5, %p205_p4 }
   0xf   :  { %p208_p7 = pnand %p207_p6, %p201_p3 }
  0x11   :  { %211 = shalt.err (!%p208_p7)
}
  0x12   :  { %20 = dma.hbm_to_vmem [thread:$0]  %s336_s0, 128, %s18_s13, [#allocation4]  }
  0x13   :  { %s212_s28 = scalar_lea.hbm %s337_s1, 512 }
  0x14   :  { %p213_p8 = scmp.ne.s32.totalorder %s337_s1, %s212_s28  ;;  %p216_p9 = scmp.lt.u32.totalorder %s212_s28, %s337_s1 }
  0x16   :  { %p218_p10 = pnand %p216_p9, %p213_p8 }
  0x18   :  { %221 = shalt.err (!%p218_p10)
}
  0x19   :  { %s222_s6 = scalar_lea.vmem %s290_s15, 512  ;;  %p227_p12 = scmp.lt.s32.totalorder %s290_s15, %s290_s15 }
  0x1a   :  { %p223_p11 = scmp.ne.s32.totalorder %s290_s15, %s222_s6  ;;  %p228_p13 = scmp.lt.s32.totalorder %s222_s6, %s222_s6 }
  0x1c   :  { %p229_p0 = por %p228_p13, %p227_p12 }
  0x1e   :  { %p230_p1 = pnand %p229_p0, %p223_p11 }
  0x20   :  { %233 = shalt.err (!%p230_p1)
}
  0x21   :  { %s264_s0 = smov 128   ;;  %s265_s7 = smov 8  }
  0x22   :  { %32 = dma.hbm_to_vmem [thread:$0]  %s337_s1, 512, %s290_s15, [#allocation7], %s264_s0, %s264_s0, %s265_s7  }
  0x23   :  { %256 = dma.done.wait [#allocation4], 128  }
  0x24   :  { %257 = vsyncadd [#allocation4], 4294967168 }
  0x25   :  { %258 = dma.done.wait [#allocation7], 512  }
  0x26   :  { %259 = vsyncadd [#allocation7], 4294966784  ;;  %v266_v0 = vmov 0.0|0.0   ;;  %vm267_vm0 = vmmov 0   ;;  %v268_v1 = vmov 0.0   ;;  %v48_v2 = vld [vmem:[#allocation6] sm:$0xff] }
  0x27   :  { %176 = vmatprep.subr.bf16.mxu0 %v266_v0  ;;  %173 = vmatprep.mubr.msk.f32.mxu0 %vm267_vm0, %v268_v1  ;;  %v49_v3 = vld [vmem:[#allocation6 + $0x8] sm:$0xff]  ;;  %v50_v4 = vld [vmem:[#allocation6 + $0x10] sm:$0xff]  ;;  %v51_v6 = vld [vmem:[#allocation6 + $0x18] sm:$0xff]  ;;  %vm52_vm1 = vcmask 261120   ;;  %s269_s11 = smov [#allocation8]  }
  0x28   :  { %v177_v5 = vpack.c.bf16 %v49_v3, %v48_v2  ;;  %v180_v7 = vpack.c.bf16 %v51_v6, %v50_v4  ;;  %v47_v8 = vld [vmem:[#allocation3] sm:$0xff]  ;;  %s148_s12 = sshll.u32 %s269_s11, 4  ;;  %s149_s12 = int_to_ptr.vmem [resolvable:$true] %s148_s12 }
  0x29   :  { %v159_v9 = vld [vmem:[%s338_s2] ss:$0 sm:$0xff]  ;;  %s234_s13 = scalar_lea.vmem %s149_s12, 128  ;;  %p239_p3 = scmp.lt.s32.totalorder %s149_s12, %s149_s12 }
  0x2a   :  { %178 = vmatpush3.bf16.msra.mxu0 %v177_v5  ;;  %p235_p2 = scmp.ne.s32.totalorder %s149_s12, %s234_s13  ;;  %p240_p4 = scmp.lt.s32.totalorder %s234_s13, %s234_s13 }
  0x2b   :  { %179 = vmatprep.subr.bf16.mxu0 %v266_v0 }
  0x2c   :  { %p241_p5 = por %p240_p4, %p239_p3 }
  0x2e   :  { %181 = vmatpush3.bf16.msra.mxu0 %v180_v7  ;;  %p242_p6 = pnand %p241_p5, %p235_p2 }
  0x31   :  { %174 = vmatmul.mubr.msk.f32.vlgmr.msra.gmra.mrb[0].mxu0 %vm52_vm1, %v47_v8 }
 0x104   :  { %v122_v10 = vpop.f32.mrb[0].mxu0 }
 0x105   :  { %v139_v11 = vadd.f32 %v159_v9, %v122_v10  ;;  %v175_v12 = vpop.f32.mrb[1].mxu0 }
 0x107   :  { %v140_v13 = vmax.f32 %v139_v11, 0.0 }
 0x109   :  { %141 = vst [vmem:[#allocation8] sm:$0xff] %v140_v13 }
 0x10a   :  { %245 = shalt.err (!%p242_p6)
}
 0x10b   :  { %s246_s16 = scalar_lea.hbm %s339_s3, 128 }
 0x10c   :  { %p247_p7 = scmp.ne.s32.totalorder %s339_s3, %s246_s16  ;;  %p250_p8 = scmp.lt.u32.totalorder %s246_s16, %s339_s3 }
 0x10e   :  { %p252_p9 = pnand %p250_p8, %p247_p7 }
 0x110   :  { %255 = shalt.err (!%p252_p9)
}
 0x111   :  { %151 = dma.vmem_to_hbm [thread:$0]  %s149_s12, 128, %s339_s3, [#allocation5]  }
 0x112   :  { %260 = dma.done.wait [#allocation5], 128  }
 0x113   :  { %261 = vsyncadd [#allocation5], 4294967168 }
 0x114   :  { %155 = vsyncpa [#allocation4], 1 }
 0x115   :  { %156 = vsyncpa [#allocation7], 1 }
 0x116   :  { %157 = vsyncpa [#allocation5], 1 }

</bundles_post_ra>
